<compile_context>
chip_gen: v5e
topology: v5e:2x2
jax: 0.10.0
libtpu: 0.0.40
codegen_flags: <defaults>
</compile_context>

<pallas_src>
import math
import functools

import numpy as np
import jax
import jax.numpy as jnp
from jax.experimental import pallas as pl
from jax.experimental.pallas import tpu as pltpu


_EPS = 1e-5
# Conservative explicit VMEM budget: fits v7x (64 MiB/TC) and is well under
# v5e/v6e's 128 MiB.  Raise toward ~100 MiB on v6e for bigger tiles.
_VMEM_LIMIT = 48 * 1024 * 1024


def _pick_seq_tile(s, target=256):
    """Largest multiple-of-8 divisor of s that is <= target (or s itself)."""
    if s <= target:
        return s
    for t in range(target, 7, -8):
        if s % t == 0:
            return t
    return s


# --------------------------------------------------------------------------- #
# Kernel 1: attention RMSNorm + fused QKV projection (bf16 MXU, f32 accum).
# --------------------------------------------------------------------------- #
def _rmsnorm_qkv_kernel(x_ref, wn_ref, wqkv_ref, qkv_ref, *, eps):
    x = x_ref[0]                                            # (tq, H) f32
    var = jnp.mean(x * x, axis=-1, keepdims=True)
    xn = x * jax.lax.rsqrt(var + eps) * wn_ref[...]         # RMSNorm, weight (1, H)
    qkv_ref[0] = jnp.dot(
        xn.astype(jnp.bfloat16), wqkv_ref[...],
        preferred_element_type=jnp.float32).astype(qkv_ref.dtype)


# --------------------------------------------------------------------------- #
# Kernel 2: flash attention with in-tile HF RoPE (rotate_half) and online softmax.
# --------------------------------------------------------------------------- #
def _flash_attn_kernel(q_ref, k_ref, v_ref, cos_q_ref, sin_q_ref,
                       cos_k_ref, sin_k_ref, mask_ref, o_ref,
                       m_sc, l_sc, acc_sc, *, sm_scale):
    kv_idx = pl.program_id(3)

    @pl.when(kv_idx == 0)
    def _init():
        m_sc[...] = jnp.full_like(m_sc, -1e30)
        l_sc[...] = jnp.zeros_like(l_sc)
        acc_sc[...] = jnp.zeros_like(acc_sc)

    def _rope(t, cos, sin):
        # HF apply_rotary_pos_emb: t*cos + rotate_half(t)*sin
        half = t.shape[-1] // 2
        rot = jnp.concatenate([-t[:, half:], t[:, :half]], axis=-1)
        return t * cos + rot * sin

    # Fold the softmax scale into q once (RoPE is linear, so order is free).
    q = _rope(q_ref[0, 0].astype(jnp.float32) * sm_scale,
              cos_q_ref[...], sin_q_ref[...])
    k = _rope(k_ref[0, 0].astype(jnp.float32), cos_k_ref[...], sin_k_ref[...])

    # QK^T via dot_general (contract last dims, no transpose), bf16 -> f32 acc.
    s = jax.lax.dot_general(
        q.astype(jnp.bfloat16), k.astype(jnp.bfloat16),
        (((1,), (1,)), ((), ())), preferred_element_type=jnp.float32)
    s = s + mask_ref[0]                                     # additive attn bias

    m_prev = m_sc[...]
    m_new = jnp.maximum(m_prev, jnp.max(s, axis=-1, keepdims=True))
    alpha = jnp.exp(m_prev - m_new)
    p = jnp.exp(s - m_new)
    l_sc[...] = alpha * l_sc[...] + jnp.sum(p, axis=-1, keepdims=True)
    acc_sc[...] = alpha * acc_sc[...] + jnp.dot(
        p.astype(jnp.bfloat16), v_ref[0, 0], preferred_element_type=jnp.float32)
    m_sc[...] = m_new

    @pl.when(kv_idx == pl.num_programs(3) - 1)
    def _finalize():
        inv = pl.reciprocal(l_sc[...], approx=True)
        o_ref[0, 0] = (acc_sc[...] * inv).astype(o_ref.dtype)


# --------------------------------------------------------------------------- #
# Kernel 3: o_proj + residual + ffn RMSNorm + gated-GELU MLP + residual.
# --------------------------------------------------------------------------- #
def _oproj_mlp_kernel(x_ref, ctx_ref, wo_ref, wn_ref, wgu_ref, wdown_ref,
                      out_ref, *, eps, intermediate):
    x = x_ref[0]                                            # (tq, H) f32 residual
    attn = jnp.dot(ctx_ref[0], wo_ref[...],
                   preferred_element_type=jnp.float32)
    h = x + attn
    var = jnp.mean(h * h, axis=-1, keepdims=True)
    hn = h * jax.lax.rsqrt(var + eps) * wn_ref[...]
    gu = jnp.dot(hn.astype(jnp.bfloat16), wgu_ref[...],
                 preferred_element_type=jnp.float32)        # (tq, 2I)
    gate = gu[:, :intermediate]
    up = gu[:, intermediate:]
    # TODO(synk): vLLM GeluAndMul defaults to exact (erf) GELU; tanh approx used here.
    act = jax.nn.gelu(gate, approximate=True) * up
    down = jnp.dot(act.astype(jnp.bfloat16), wdown_ref[...],
                   preferred_element_type=jnp.float32)
    out_ref[0] = (h + down).astype(out_ref.dtype)


# --------------------------------------------------------------------------- #
# One PixtralHFTransformerBlock forward.
# --------------------------------------------------------------------------- #
def pixtral_block(x, attention_mask, cos, sin, w, *, n_heads):
    B, S, H = x.shape
    D = H // n_heads
    I = w["w_down"].shape[0]
    tq = _pick_seq_tile(S)
    tkv = _pick_seq_tile(S)
    nq, nkv = S // tq, S // tkv

    cparams2 = pltpu.CompilerParams(
        dimension_semantics=("parallel", "parallel"),
        vmem_limit_bytes=_VMEM_LIMIT)

    # ---- 1. attention RMSNorm + fused QKV projection ------------------------
    qkv = pl.pallas_call(
        functools.partial(_rmsnorm_qkv_kernel, eps=_EPS),
        out_shape=jax.ShapeDtypeStruct((B, S, 3 * H), jnp.bfloat16),
        grid_spec=pltpu.PrefetchScalarGridSpec(
            num_scalar_prefetch=0,
            grid=(B, nq),
            in_specs=[
                pl.BlockSpec((1, tq, H), lambda b, i: (b, i, 0)),     # x
                pl.BlockSpec((1, H), lambda b, i: (0, 0)),            # attn_norm
                pl.BlockSpec((H, 3 * H), lambda b, i: (0, 0)),        # w_qkv (bf16)
            ],
            out_specs=pl.BlockSpec((1, tq, 3 * H), lambda b, i: (b, i, 0)),
        ),
        compiler_params=cparams2,
    )(x, w["attn_norm"], w["w_qkv"])

    # ---- 2. head split: layout plumbing in XLA so kernel stores stay dense --
    def to_heads(t):
        return t.reshape(B, S, n_heads, D).transpose(0, 2, 1, 3)

    q = to_heads(qkv[..., :H])
    k = to_heads(qkv[..., H:2 * H])
    v = to_heads(qkv[..., 2 * H:])
    mask = attention_mask[:, 0]                              # (B, S, S), shared by heads

    # ---- 3. flash attention --------------------------------------------------
    ctx = pl.pallas_call(
        functools.partial(_flash_attn_kernel, sm_scale=1.0 / math.sqrt(D)),
        out_shape=jax.ShapeDtypeStruct((B, n_heads, S, D), jnp.bfloat16),
        grid_spec=pltpu.PrefetchScalarGridSpec(
            num_scalar_prefetch=0,
            grid=(B, n_heads, nq, nkv),
            in_specs=[
                pl.BlockSpec((1, 1, tq, D), lambda b, h, i, j: (b, h, i, 0)),   # q
                pl.BlockSpec((1, 1, tkv, D), lambda b, h, i, j: (b, h, j, 0)),  # k
                pl.BlockSpec((1, 1, tkv, D), lambda b, h, i, j: (b, h, j, 0)),  # v
                pl.BlockSpec((tq, D), lambda b, h, i, j: (i, 0)),               # cos(q)
                pl.BlockSpec((tq, D), lambda b, h, i, j: (i, 0)),               # sin(q)
                pl.BlockSpec((tkv, D), lambda b, h, i, j: (j, 0)),              # cos(k)
                pl.BlockSpec((tkv, D), lambda b, h, i, j: (j, 0)),              # sin(k)
                pl.BlockSpec((1, tq, tkv), lambda b, h, i, j: (b, i, j)),       # mask
            ],
            out_specs=pl.BlockSpec((1, 1, tq, D), lambda b, h, i, j: (b, h, i, 0)),
            scratch_shapes=[
                pltpu.VMEM((tq, 1), jnp.float32),   # running max m
                pltpu.VMEM((tq, 1), jnp.float32),   # running denom l
                pltpu.VMEM((tq, D), jnp.float32),   # accumulator
            ],
        ),
        compiler_params=pltpu.CompilerParams(
            dimension_semantics=("parallel", "parallel", "parallel", "arbitrary"),
            vmem_limit_bytes=_VMEM_LIMIT),
    )(q, k, v, cos, sin, cos, sin, mask)

    # merge heads back to a lane-dense (B, S, H) slab for o_proj
    ctx = ctx.transpose(0, 2, 1, 3).reshape(B, S, H)

    # ---- 4. o_proj + residual + ffn RMSNorm + MLP + residual ----------------
    out = pl.pallas_call(
        functools.partial(_oproj_mlp_kernel, eps=_EPS, intermediate=I),
        out_shape=jax.ShapeDtypeStruct((B, S, H), x.dtype),
        grid_spec=pltpu.PrefetchScalarGridSpec(
            num_scalar_prefetch=0,
            grid=(B, nq),
            in_specs=[
                pl.BlockSpec((1, tq, H), lambda b, i: (b, i, 0)),     # residual x
                pl.BlockSpec((1, tq, H), lambda b, i: (b, i, 0)),     # attn ctx
                pl.BlockSpec((H, H), lambda b, i: (0, 0)),            # w_o
                pl.BlockSpec((1, H), lambda b, i: (0, 0)),            # ffn_norm
                pl.BlockSpec((H, 2 * I), lambda b, i: (0, 0)),        # w_gate_up
                pl.BlockSpec((I, H), lambda b, i: (0, 0)),            # w_down
            ],
            out_specs=pl.BlockSpec((1, tq, H), lambda b, i: (b, i, 0)),
        ),
        compiler_params=cparams2,
    )(x, ctx, w["w_o"], w["ffn_norm"], w["w_gu"], w["w_down"])

    return out


def pixtral_hf_transformer(x, attention_mask, position_embeddings, layer_weights,
                           *, n_heads, return_all_hidden_states=False):
    cos, sin = position_embeddings
    hidden_states_pool = [x]
    for w in layer_weights:
        x = pixtral_block(x, attention_mask, cos, sin, w, n_heads=n_heads)
        if return_all_hidden_states:
            hidden_states_pool.append(x)
    if return_all_hidden_states:
        return hidden_states_pool
    return x


# --------------------------------------------------------------------------- #
# Pure-JAX f32 reference (mirrors the PyTorch module).
# --------------------------------------------------------------------------- #
def _rms_norm_ref(x, weight, eps=_EPS):
    var = jnp.mean(x * x, axis=-1, keepdims=True)
    return x * jax.lax.rsqrt(var + eps) * weight


def _rotate_half_ref(x):
    half = x.shape[-1] // 2
    return jnp.concatenate([-x[..., half:], x[..., :half]], axis=-1)


def reference_block(x, attention_mask, cos, sin, w, *, n_heads, eps=_EPS):
    B, S, H = x.shape
    D = H // n_heads
    xn = _rms_norm_ref(x, w["attn_norm"], eps)

    def proj(wm):
        return (xn @ wm).reshape(B, S, n_heads, D).transpose(0, 2, 1, 3)

    q, k, v = proj(w["wq"]), proj(w["wk"]), proj(w["wv"])
    c, s_ = cos[None, None], sin[None, None]
    q = q * c + _rotate_half_ref(q) * s_
    k = k * c + _rotate_half_ref(k) * s_
    scores = jnp.einsum("bhqd,bhkd->bhqk", q, k) / math.sqrt(D) + attention_mask
    p = jax.nn.softmax(scores, axis=-1)
    ctx = jnp.einsum("bhqk,bhkd->bhqd", p, v)
    ctx = ctx.transpose(0, 2, 1, 3).reshape(B, S, H)
    h = x + ctx @ w["wo"]
    hn = _rms_norm_ref(h, w["ffn_norm"], eps)
    act = jax.nn.gelu(hn @ w["wgate"], approximate=True) * (hn @ w["wup"])
    return h + act @ w["wdown"]


def reference_transformer(x, attention_mask, position_embeddings, ref_weights,
                          *, n_heads):
    cos, sin = position_embeddings
    for w in ref_weights:
        x = reference_block(x, attention_mask, cos, sin, w, n_heads=n_heads)
    return x


# --------------------------------------------------------------------------- #
if __name__ == "__main__":
    batch, patches, hidden = 2, 8, 32
    n_heads, intermediate, num_layers = 2, 64, 2
    head_dim = hidden // n_heads
    rope_theta = 10000.0

    root = jax.random.PRNGKey(0)
    kx, kw = jax.random.split(root)
    x = jax.random.normal(kx, (batch, patches, hidden), jnp.float32)

    # Pixtral-style block-diagonal additive attention mask, shape (B, 1, S, S).
    image_patch_counts = [[5, 3], [4, 4]]
    mask_np = np.full((batch, 1, patches, patches), -1e9, dtype=np.float32)
    for b, counts in enumerate(image_patch_counts):
        start = 0
        for c in counts:
            mask_np[b, 0, start:start + c, start:start + c] = 0.0
            start += c
    attention_mask = jnp.asarray(mask_np)

    # HF-style rotary tables (cos, sin) of shape (patches, head_dim).
    inv_freq = rope_theta ** (-np.arange(0, head_dim, 2, dtype=np.float32) / head_dim)
    freqs = np.arange(patches, dtype=np.float32)[:, None] * inv_freq[None, :]
    emb = np.concatenate([freqs, freqs], axis=-1)
    cos = jnp.asarray(np.cos(emb), jnp.float32)
    sin = jnp.asarray(np.sin(emb), jnp.float32)

    layer_weights, ref_weights = [], []
    for kl in jax.random.split(kw, num_layers):
        kq, kk, kv, ko, kg, ku, kd, kn1, kn2 = jax.random.split(kl, 9)
        sh = 1.0 / math.sqrt(hidden)
        si = 1.0 / math.sqrt(intermediate)
        # Weights stored (in, out) = transpose of torch nn.Linear .weight.
        wq = sh * jax.random.normal(kq, (hidden, hidden), jnp.float32)
        wk = sh * jax.random.normal(kk, (hidden, hidden), jnp.float32)
        wv = sh * jax.random.normal(kv, (hidden, hidden), jnp.float32)
        wo = sh * jax.random.normal(ko, (hidden, hidden), jnp.float32)
        wgate = sh * jax.random.normal(kg, (hidden, intermediate), jnp.float32)
        wup = sh * jax.random.normal(ku, (hidden, intermediate), jnp.float32)
        wdown = si * jax.random.normal(kd, (intermediate, hidden), jnp.float32)
        attn_norm = 1.0 + 0.1 * jax.random.normal(kn1, (1, hidden), jnp.float32)
        ffn_norm = 1.0 + 0.1 * jax.random.normal(kn2, (1, hidden), jnp.float32)

        w_qkv = jnp.concatenate([wq, wk, wv], axis=1).astype(jnp.bfloat16)
        w_gu = jnp.concatenate([wgate, wup], axis=1).astype(jnp.bfloat16)
        w_o = wo.astype(jnp.bfloat16)
        w_down = wdown.astype(jnp.bfloat16)

        layer_weights.append(dict(attn_norm=attn_norm, w_qkv=w_qkv, w_o=w_o,
                                  ffn_norm=ffn_norm, w_gu=w_gu, w_down=w_down))

        # Reference uses the same bf16-quantized weights (upcast to f32) so the
        # check isolates kernel correctness from weight quantization.
        f32 = lambda a: a.astype(jnp.float32)
        ref_weights.append(dict(
            attn_norm=attn_norm,
            wq=f32(w_qkv[:, :hidden]),
            wk=f32(w_qkv[:, hidden:2 * hidden]),
            wv=f32(w_qkv[:, 2 * hidden:]),
            wo=f32(w_o),
            ffn_norm=ffn_norm,
            wgate=f32(w_gu[:, :intermediate]),
            wup=f32(w_gu[:, intermediate:]),
            wdown=f32(w_down)))

    out = pixtral_hf_transformer(x, attention_mask, (cos, sin), layer_weights,
                                 n_heads=n_heads)
    out = jax.block_until_ready(out)

    ref = reference_transformer(x, attention_mask, (cos, sin), ref_weights,
                                n_heads=n_heads)
    ref = jax.block_until_ready(ref)

    np.testing.assert_allclose(np.asarray(out), np.asarray(ref),
                               rtol=5e-2, atol=5e-2)

    # return_all_hidden_states path (same module semantics).
    pool = pixtral_hf_transformer(x, attention_mask, (cos, sin), layer_weights,
                                  n_heads=n_heads, return_all_hidden_states=True)
    assert len(pool) == num_layers + 1
    jax.block_until_ready(pool[-1])

    print("KERNEL_OK")
</pallas_src>

<mosaic_0001>
module attributes {stable_mosaic.version = 11 : i64} {
  func.func @_rmsnorm_qkv_kernel(%arg0: i32, %arg1: i32, %arg2: memref<1x8x32xf32, #tpu.memory_space<vmem>>, %arg3: memref<1x32xf32, #tpu.memory_space<vmem>>, %arg4: memref<32x96xbf16, #tpu.memory_space<vmem>>, %arg5: memref<1x8x96xbf16, #tpu.memory_space<vmem>>) attributes {dimension_semantics = [#tpu.dimension_semantics<parallel>, #tpu.dimension_semantics<parallel>], iteration_bounds = array<i64: 2, 1>, scalar_prefetch = 0 : i64, scratch_operands = 0 : i64, tpu.core_type = #tpu.core_type<tc>, window_params = [{transform_indices = @transform_0, window_bounds = array<i64: 1, 8, 32>}, {pipeline_mode = #tpu.pipeline_mode<synchronous>, transform_indices = @transform_1, window_bounds = array<i64: 1, 32>}, {pipeline_mode = #tpu.pipeline_mode<synchronous>, transform_indices = @transform_2, window_bounds = array<i64: 32, 96>}, {transform_indices = @transform_3, window_bounds = array<i64: 1, 8, 96>}]} {
    %c0 = arith.constant 0 : index
    %c0_0 = arith.constant 0 : index
    %c0_1 = arith.constant 0 : index
    %0 = vector.load %arg2[%c0, %c0_0, %c0_1] : memref<1x8x32xf32, #tpu.memory_space<vmem>>, vector<1x8x32xf32>
    %1 = vector.shape_cast %0 : vector<1x8x32xf32> to vector<8x32xf32>
    %2 = arith.mulf %1, %1 : vector<8x32xf32>
    %cst = arith.constant dense<0.000000e+00> : vector<8xf32>
    %3 = vector.multi_reduction <add>, %2, %cst [1] : vector<8x32xf32> to vector<8xf32>
    %4 = vector.shape_cast %3 : vector<8xf32> to vector<8x1xf32>
    %cst_2 = arith.constant 3.200000e+01 : f32
    %5 = vector.broadcast %cst_2 : f32 to vector<8x1xf32>
    %6 = arith.divf %4, %5 : vector<8x1xf32>
    %cst_3 = arith.constant 9.99999974E-6 : f32
    %7 = vector.broadcast %cst_3 : f32 to vector<8x1xf32>
    %8 = arith.addf %6, %7 : vector<8x1xf32>
    %9 = math.rsqrt %8 : vector<8x1xf32>
    %10 = vector.broadcast %9 : vector<8x1xf32> to vector<8x32xf32>
    %11 = arith.mulf %1, %10 : vector<8x32xf32>
    %c0_4 = arith.constant 0 : index
    %c0_5 = arith.constant 0 : index
    %12 = vector.load %arg3[%c0_4, %c0_5] : memref<1x32xf32, #tpu.memory_space<vmem>>, vector<1x32xf32>
    %13 = vector.broadcast %12 : vector<1x32xf32> to vector<8x32xf32>
    %14 = arith.mulf %11, %13 : vector<8x32xf32>
    %15 = arith.truncf %14 : vector<8x32xf32> to vector<8x32xbf16>
    %c0_6 = arith.constant 0 : index
    %c0_7 = arith.constant 0 : index
    %16 = vector.load %arg4[%c0_6, %c0_7] : memref<32x96xbf16, #tpu.memory_space<vmem>>, vector<32x96xbf16>
    %cst_8 = arith.constant dense<0.000000e+00> : vector<8x96xf32>
    %17 = tpu.matmul %15, %16, %cst_8 {dimension_numbers = #tpu.dot_dimension_numbers<[1], [0], [0], [1], [0, 0, 1, 1], [], []>} : vector<8x32xbf16>, vector<32x96xbf16>, vector<8x96xf32> -> vector<8x96xf32>
    %18 = arith.truncf %17 : vector<8x96xf32> to vector<8x96xbf16>
    %c0_9 = arith.constant 0 : index
    %c0_10 = arith.constant 0 : index
    %c0_11 = arith.constant 0 : index
    %19 = vector.load %arg5[%c0_9, %c0_10, %c0_11] : memref<1x8x96xbf16, #tpu.memory_space<vmem>>, vector<1x8x96xbf16>
    %20 = vector.shape_cast %19 : vector<1x8x96xbf16> to vector<8x96xbf16>
    %21 = vector.shape_cast %18 : vector<8x96xbf16> to vector<1x8x96xbf16>
    tpu.vector_store %arg5[%c0_9, %c0_10, %c0_11], %21 {strides = array<i32>} : memref<1x8x96xbf16, #tpu.memory_space<vmem>>, vector<1x8x96xbf16>,
    return
  }
  func.func @transform_0(%arg0: i32, %arg1: i32) -> (i32, i32, i32) {
    %c0_i32 = arith.constant 0 : i32
    %c0_i32_0 = arith.constant 0 : i32
    return %arg0, %arg1, %c0_i32 : i32, i32, i32
  }
  func.func @transform_1(%arg0: i32, %arg1: i32) -> (i32, i32) {
    %c0_i32 = arith.constant 0 : i32
    %c0_i32_0 = arith.constant 0 : i32
    %c0_i32_1 = arith.constant 0 : i32
    return %c0_i32, %c0_i32_0 : i32, i32
  }
  func.func @transform_2(%arg0: i32, %arg1: i32) -> (i32, i32) {
    %c0_i32 = arith.constant 0 : i32
    %c0_i32_0 = arith.constant 0 : i32
    %c0_i32_1 = arith.constant 0 : i32
    return %c0_i32, %c0_i32_0 : i32, i32
  }
  func.func @transform_3(%arg0: i32, %arg1: i32) -> (i32, i32, i32) {
    %c0_i32 = arith.constant 0 : i32
    %c0_i32_0 = arith.constant 0 : i32
    return %arg0, %arg1, %c0_i32 : i32, i32, i32
  }
}

</mosaic_0001>

<bundles_post_ra>
// kernel: tpu_custom_call.1
= control target key start
LH: loop header
LB: loop body
LE: loop exit
PB: predicated region body
PF: predicated region fallthrough
CT: control target
= control target key end

     0   :  { %8 = vsyncpa [#allocation3], 0  ;;  %s891_s0 = inlined_call_operand.hbm [shape: f32[2,8,32], index: 0, kind: input, shape index: {}]   ;;  %s892_s1 = inlined_call_operand.hbm [shape: f32[1,32], index: 1, kind: input, shape index: {}]   ;;  %s893_s2 = inlined_call_operand.hbm [shape: bf16[32,96], index: 2, kind: input, shape index: {}]   ;;  %s894_s3 = inlined_call_operand.hbm [shape: bf16[2,8,96], index: 3, kind: output, shape index: {}]  }
   0x1   :  { %10 = vsyncpa [#allocation3 + $0x1], 0 }
   0x2   :  { %11 = vsyncpa [#allocation6], 0 }
   0x3   :  { %12 = vsyncpa [#allocation4], 0 }
   0x4   :  { %14 = vsyncpa [#allocation4 + $0x1], 0  ;;  %s742_s12 = smov 0   ;;  %s744_s13 = smov 0  }
   0x5   :  { %s746_s14 = smov 0   ;;  %s748_s15 = smov 0  }
   0x6   :  { %s750_s16 = smov 0   ;;  %s752_s17 = smov 0  }
   0x7 LB: > { %s420_s18 = sadd.s32 4294967295, %s715_s17   ;;  %s421_s19 = sadd.s32 4294967294, %s715_s17   ;;  %s715_s17 = sphi %s752_s17, %s20_s17   ;;  %s711_s16 = sphi %s750_s16, %s904_s16   ;;  %s707_s15 = sphi %s748_s15, %s903_s15   ;;  %s703_s14 = sphi %s746_s14, %s902_s14   ;;  %s699_s13 = sphi %s744_s13, %s901_s13   ;;  %s695_s12 = sphi %s742_s12, %s900_s12  }
   0x8   : > { %p54_p0 = scmp.ne.s32.totalorder %s699_s13, %s695_s12  ;;  %p778_p1 = scmp.eq.s32.totalorder %s420_s18, 0 }
   0x9   : > { %p128_p2 = scmp.eq.s32.totalorder %s421_s19, 1  ;;  %p422_p4 = scmp.ge.s32.totalorder %s715_s17, 1 }
   0xa   : > { %p784_p3 = por %p778_p1, %p54_p0  ;;  %p135_p6 = scmp.lt.s32.totalorder %s715_s17, 3 }
   0xb   : > { %p789_p5 = por %p128_p2, %p54_p0  ;;  %s147_s25 = sshll.u32 %s892_s1, 4  ;;  %s148_s25 = int_to_ptr.hbm [resolvable:$true] %s147_s25 }
   0xc   : > { %p797_p7 = pnand %p422_p4, %p135_p6  ;;  %p425_p8 = scmp.ge.s32.totalorder %s715_s17, 2 }
   0xd   : > { %s717_s27 = smov [#allocation5]   ;;  %s158_s4 = sshll.u32 %s893_s2, 4  ;;  %s159_s4 = int_to_ptr.hbm [resolvable:$true] %s158_s4 }
   0xe   : > { %p460_p9 = pneg %p797_p7  ;;  %s149_s28 = sshll.u32 %s717_s27, 4  ;;  %s150_s28 = int_to_ptr.vmem [resolvable:$true] %s149_s28 }
   0xf   : > { %s718_s5 = smov [#allocation7]   ;;  %s719_s7 = smov 64  }
  0x10   : > { %p461_p10 = pnand %p460_p9, %p778_p1  ;;  %s160_s6 = sshll.u32 %s718_s5, 4  ;;  %s161_s6 = int_to_ptr.vmem [resolvable:$true] %s160_s6 }
  0x11   : > { %s720_s8 = smov 4   ;;  %p122_p11 = scmp.eq.s32.totalorder %s420_s18, 1 }
  0x12   : > { %463 = dma.hbm_to_vmem [thread:$0]  (!%p461_p10), %s148_s25, 16, %s150_s28, [#allocation6]  }
  0x13   : > { %466 = dma.hbm_to_vmem [thread:$0]  (!%p461_p10), %s159_s4, 256, %s161_s6, [#allocation6], %s719_s7, %s719_s7, %s720_s8  }
  0x14   : > { %s32_s9 = sadd.s32 1, %s711_s16  ;;  %s41_s10 = sadd.s32 1, %s703_s14 }
  0x15   : > { %p34_p12 = scmp.ge.s32.totalorder %s32_s9, 2  ;;  %p48_p13 = scmp.ne.s32.totalorder %s703_s14, %s699_s13 }
  0x16   : > { %p49_p0 = scmp.eq.s32.totalorder %s715_s17, 0  ;;  %p477_p4 = scmp.lt.s32.totalorder %s715_s17, 2 }
  0x17   : > { %s906_s9 = smov (%p34_p12, %s32_s9), 0  ;;  %p818_p2 = por %p122_p11, %p48_p13 }
  0x18   : > { %s36_s19 = ssub.s32 %s711_s16, %s906_s9  ;;  %s174_s23 = sand.u32 1, %s703_s14  }
  0x19   : > { %p39_p6 = scmp.eq.s32.totalorder %s36_s19, 0  ;;  %p50_p9 = por %p49_p0, %p48_p13 }
  0x1a   : > { %s426_s24 = sshll.u32 %s174_s23, 3  ;;  %s427_s18 = sshll.u32 %s711_s16, 3 }
  0x1b   : > { %s828_s25 = scalar_select %p39_p6, %s703_s14, %s41_s10  }
  0x1c   : > { %s183_s29 = scalar_lea.hbm %s891_s0, %s427_s18  ;;  %s178_s4 = scalar_lea.vmem [#allocation2], %s426_s24 }
  0x1d   : > { %s185_s30 = sshll.u32 %s183_s29, 4  ;;  %s187_s5 = sshll.u32 %s178_s4, 4  ;;  %s186_s30 = int_to_ptr.hbm [resolvable:$true] %s185_s30  ;;  %s188_s5 = int_to_ptr.vmem [resolvable:$true] %s187_s5 }
  0x1e   : > { %p468_p10 = pnand %p477_p4, %p50_p9  ;;  %s175_s6 = scalar_lea.sflag [#allocation3], %s174_s23 }
  0x1f   : > { %196 = sbr.rel (%p797_p7) target bundleno = 321 (0x141), region = 32  ;;  %s838_s7 = sand.u32 (!%p797_p7), 1, %s699_s13  }
  0x20   : > { %470 = dma.hbm_to_vmem [thread:$0]  (!%p468_p10), %s186_s30, 128, %s188_s5, %s175_s6  }
  0x21   : > { %s429_s8 = sshll.u32 (!%p797_p7), %s838_s7, 3  ;;  %s199_s10 = scalar_lea.sflag (!%p797_p7), [#allocation3], %s838_s7 }
  0x22   : > { %s202_s19 = scalar_lea.vmem (!%p797_p7), [#allocation2], %s429_s8 }
  0x24   : > { %682 = dma.done.wait (%p784_p3), %s199_s10, 128  }
  0x25   : > { %684 = vsyncadd (%p784_p3), %s199_s10, 4294967168 }
  0x26   : > { %686 = dma.done.wait (%p778_p1), [#allocation6], 272  }
  0x27   : > { %688 = vsyncadd (%p778_p1), [#allocation6], 4294967024  ;;  %v237_v0 = vld [vmem:[%s202_s19] sm:$0xff]  ;;  %vm239_vm0 = vcmask 261120   ;;  %v721_v3 = vmov 32.0   ;;  %v446_v9 = vld [vmem:[#allocation7] sm:$0xff] }
  0x28   : > { %v238_v1 = vmul.f32 %v237_v0, %v237_v0  ;;  %535 = vrcp.f32 %v721_v3  ;;  %v447_v7 = vld [vmem:[#allocation7 + $0x8] sm:$0xff]  ;;  %v534_v21 = vld [vmem:[#allocation5] ss:$0 sm:$0xff]  ;;  %s443_s20 = sshll.u32 %s707_s15, 2  ;;  %s432_s21 = sshll.u32 %s838_s7, 2  ;;  %vm302_vm5 = vcmask 781312  }
  0x29   : > { %294 = vmatpush.bf16.msra.mxu0 %v447_v7  ;;  %s316_s24 = scalar_lea.hbm %s894_s3, %s443_s20  ;;  %s235_s18 = scalar_lea.vmem [#allocation8], %s432_s21 }
  0x2a   : > { %v240_v2 = vsel %vm239_vm0, %v238_v1, 0.0  ;;  %s318_s27 = sshll.u32 %s235_s18, 4  ;;  %s320_s28 = sshll.u32 %s316_s24, 4  ;;  %s319_s27 = int_to_ptr.vmem [resolvable:$true] %s318_s27  ;;  %s321_s28 = int_to_ptr.hbm [resolvable:$true] %s320_s28 }
  0x2b   : > { %241 = vadd.xlane.f32.xlu0 %v240_v2  ;;  %s305_s29 = scalar_lea.sflag [#allocation4], %s838_s7  ;;  %s643_s30 = sshra.s32 %s321_s28, 4  ;;  %s644_s30 = int_to_ptr.hbm [resolvable:$true] %s643_s30 }
  0x2c   : > { %s645_s4 = scalar_lea.hbm %s644_s30, 4  ;;  %s649_s6 = scalar_lea.hbm %s894_s3, 8 }
  0x2d   : > { %295 = vmatpush.bf16.msra.mxu0 %v446_v9  ;;  %p646_p1 = scmp.ne.s32.totalorder %s644_s30, %s645_s4  ;;  %p650_p11 = scmp.lt.s32.totalorder %s644_s30, %s894_s3 }
  0x2e   : > { %v536_v4 = vpop.eup %535  ;;  %p651_p12 = scmp.lt.s32.totalorder %s649_s6, %s645_s4 }
  0x2f   : > { %v244_v5 = vmul.f32 32.0, %v536_v4  ;;  %vm248_vm1 = vweird.f32 %v536_v4  ;;  %p647_p3 = pnand %p646_p1, %p818_p2 }
  0x30   : > { %p652_p13 = por %p651_p12, %p650_p11 }
  0x31   : > { %v245_v6 = vsub.f32 1.0, %v244_v5  ;;  %p648_p7 = pneg %p647_p3 }
  0x33   : > { %v246_v8 = vmul.f32 %v536_v4, %v245_v6  ;;  %p653_p0 = pnand %p652_p13, %p648_p7 }
  0x35   : > { %v247_v10 = vadd.f32 %v536_v4, %v246_v8 }
  0x37   : > { %v249_v11 = vsel %vm248_vm1, %v536_v4, %v247_v10 }
  0x9e   : > { %v242_v12 = vpop.xlane.xlu0 %241 }
  0x9f   : > { %v250_v13 = vmul.f32 %v249_v11, %v242_v12 }
  0xa1   : > { %v251_v14 = vadd.f32 1e-05, %v250_v13 }
  0xa3   : > { %537 = vrsqrt.f32 %v251_v14  ;;  %vm258_vm3 = vweird.f32 %v251_v14 }
  0xa9   : > { %v538_v15 = vpop.eup %537 }
  0xaa   : > { %v253_v16 = vmul.f32 %v538_v15, %v251_v14  ;;  %vm259_vm2 = vweird.f32 %v538_v15 }
  0xab   : > { %vm260_vm4 = vmor %vm258_vm3, %vm259_vm2 }
  0xac   : > { %v254_v17 = vmul.f32 %v538_v15, %v253_v16 }
  0xae   : > { %v255_v18 = vmul.f32 0.5, %v254_v17 }
  0xb0   : > { %v256_v19 = vsub.f32 1.5, %v255_v18 }
  0xb2   : > { %v257_v20 = vmul.f32 %v538_v15, %v256_v19 }
  0xb4   : > { %v261_v22 = vsel %vm260_vm4, %v538_v15, %v257_v20 }
  0xb5   : > { %v262_v23 = vmul.f32 %v261_v22, %v237_v0 }
  0xb7   : > { %v267_v24 = vmul.f32 %v534_v21, %v262_v23 }
  0xb9   : > { %v268_v25 = vpack.c.bf16 %v267_v24, %v267_v24 }
  0xbb   : > { %441 = vmatmul.msk.bf16.vlgmr.msra.gmra.mxu0 %vm239_vm0, %v268_v25 }
 0x138   : > { %v297_v26 = vpop.f32.mrf.mxu0 }
 0x139   : > { %v301_v27 = vpack.c.bf16 %v297_v26, %v297_v26 }
 0x13b   : > { %303 = vst.msk [vmem:[%s235_s18] sm:$0xf] %vm302_vm5, %v301_v27 }
 0x13c   : > { %656 = shalt.err (!%p653_p0)
}
 0x13d   : > { %458 = dma.vmem_to_hbm [thread:$0]  (%p818_p2), %s319_s27, 64, %s321_s28, %s305_s29  }
 0x140   : > { %v299_v28 = vpop.f32.mrf.mxu0 }
 0x141 PF: > { %s332_s7 = sand.u32 1, %s695_s12   ;;  %p472_p4 = pnand %p425_p8, %p789_p5 }
 0x142   : > { %s333_s19 = scalar_lea.sflag [#allocation4], %s332_s7 }
 0x143   : > { %p473_p6 = pneg %p472_p4 }
 0x145   : > { %690 = dma.done.wait (%p473_p6), %s333_s19, 64  }
 0x146   : > { %692 = vsyncadd (%p473_p6), %s333_s19, 4294967232  ;;  %s20_s17 = sadd.s32 1, %s715_s17   ;;  %s900_s12 = smov %s699_s13 }
 0x147   : > { %p17_p9 = scmp.ge.s32.totalorder %s20_s17, 4   ;;  %s901_s13 = smov %s703_s14 }
 0x148   : > { %s902_s14 = smov %s828_s25  ;;  %s903_s15 = smov %s711_s16 }
 0x149   : > { %s904_s16 = smov %s906_s9  ;;  %19 = sbr.rel (!%p17_p9) target bundleno = 7 (0x7), region = 85 }
 0x14e   :  { %339 = vsyncpa [#allocation3], 1 }
 0x14f   :  { %341 = vsyncpa [#allocation3 + $0x1], 1 }
 0x150   :  { %342 = vsyncpa [#allocation6], 1 }
 0x151   :  { %343 = vsyncpa [#allocation4], 1 }
 0x152   :  { %345 = vsyncpa [#allocation4 + $0x1], 1 }

</bundles_post_ra>
